<compile_context>
chip_gen: v5e
topology: v5e:2x2
jax: 0.10.0
libtpu: 0.0.40
codegen_flags: <defaults>
</compile_context>

<pallas_src>
import jax
import jax.numpy as jnp
from jax import lax
from jax.experimental import pallas as pl
from jax.experimental.pallas import tpu as pltpu

_INV_SQRT2 = 0.7071067811865476


def _log_ndtr(y):
    """log(Phi(y)) for float32 y, stable over the whole real line.

    EUP budget per element: one approx reciprocal (+ VPU Newton refinement),
    one exp, one log (the log argument is select-shared between branches).
    """
    z = jnp.abs(y) * _INV_SQRT2
    w = 1.0 + 0.5 * z
    t = pl.reciprocal(w, approx=True)
    t = t * (2.0 - w * t)                      # Newton step on the VPU (~1e-7 rel)
    poly = (-1.26551223 + t * (1.00002368 + t * (0.37409196 + t * (0.09678418 +
            t * (-0.18628806 + t * (0.27886807 + t * (-1.13520398 + t * (1.48851587 +
            t * (-0.82215223 + t * 0.17087277)))))))))
    # TODO(synk): z*z overflows f32 for |y| > ~2.6e19 (loss -> inf) where the
    # f64 PyTorch reference would still be finite; unreachable for real logits.
    u = poly - z * z                           # erfc(z) ~= t * exp(u),  z >= 0
    q = 0.5 * t * jnp.exp(u)                   # q = Phi(-|y|); harmless underflow for big z
    neg = y < 0.0
    # Single shared log.  Negative branch: log(q) = u + log(0.5*t)  (the exp is
    # folded out analytically, so it never underflows).  Positive branch: log(1-q).
    log_shared = jnp.log(jnp.where(neg, 0.5 * t, 1.0 - q))
    neg_branch = u + log_shared
    pos_branch = jnp.where(q < 1e-4, -q * (1.0 + 0.5 * q), log_shared)
    return jnp.where(neg, neg_branch, pos_branch)


def _make_kernel(n_rows, block_rows, k, need_row_mask):
    def kernel(logits_ref, targets_ref, out_ref):
        x = logits_ref[...].astype(jnp.float32)        # (tn, kc); cast in-kernel
        tn, kc = x.shape
        cols = lax.broadcasted_iota(jnp.int32, (tn, kc), 1)
        tgt = targets_ref[...]                         # (tn, k) packed-lane target indices
        is_target = cols == tgt[:, 0:1]
        for s in range(1, k):                          # static unroll; k <= 16, VPU-only
            is_target = is_target | (cols == tgt[:, s:s + 1])
        # Fold the one-hot select into the sign so log_ndtr runs once per element.
        y = jnp.where(is_target, x, -x)
        loss = -_log_ndtr(y)
        if need_row_mask:                              # static: only if the grid is ragged
            rows = (lax.broadcasted_iota(jnp.int32, (tn, kc), 0)
                    + pl.program_id(0) * block_rows)
            loss = jnp.where(rows < n_rows, loss, 0.0)  # select: tail garbage can't propagate
        # Row-only (sublane) reduction; lanes are kept so the store stays lane-dense
        # and the cross-lane reduction happens once in the XLA epilogue.
        colsum = jnp.sum(loss, axis=0, keepdims=True)  # (1, kc)
        ri = lax.broadcasted_iota(jnp.int32, (8, kc), 0)
        out_ref[...] = jnp.where(ri == 0, jnp.broadcast_to(colsum, (8, kc)), 0.0)
    return kernel


def normcdf_nll_loss(logits, targets, *, block_rows=None):
    """Pallas implementation of NormCDFNLLLoss.forward(logits, targets)."""
    n, c = logits.shape
    itemsize = jnp.dtype(logits.dtype).itemsize
    sub = max(8, 32 // itemsize)                       # sublane multiple for the input dtype

    # Lane packing: fold k rows into the lane axis when C < 128.  k must divide N
    # so no padding pass is ever needed (the reshape of a contiguous array is free).
    k = 1
    if c < 128:
        for cand in range(min(max(128 // c, 1), 16), 1, -1):
            if n % cand == 0:
                k = cand
                break
    n_rows = n // k
    kc = k * c

    # TODO(synk): targets outside [0, C) silently become "no target in this row"
    # (torch's F.one_hot would raise); inputs are assumed valid.
    tgt = targets.astype(jnp.int32).reshape(n_rows, k)
    enc = tgt + (jnp.arange(k, dtype=jnp.int32) * c)[None, :]   # packed lane index of target
    x2d = logits.reshape(n_rows, kc)

    # ~2 MiB per buffer, counting the lane-padded (to 128) int32 target tile; with
    # default double-buffering this fits every generation's scoped VMEM (incl. v5e's
    # 16 MiB default and v7x's 64 MiB physical).
    row_bytes = kc * itemsize + 128 * 4 * ((k + 127) // 128)
    if block_rows is None:
        block_rows = max(sub, (2 * 1024 * 1024) // max(row_bytes, 1))
    block_rows = max(sub, (block_rows // sub) * sub)
    # Guarantee >=2 balanced row blocks when there is enough data so v7x's two
    # TensorCores both get work (neutral on single-TC v5e/v6e).
    if n_rows > 2 * sub:
        half = (((n_rows + 1) // 2) + sub - 1) // sub * sub
        block_rows = min(block_rows, max(sub, half))
    if block_rows >= n_rows:
        block_rows = n_rows                            # single full-extent block
    num_blocks = pl.cdiv(n_rows, block_rows)
    need_row_mask = num_blocks * block_rows != n_rows  # ragged last block (no jnp.pad)

    cost = pl.CostEstimate(
        flops=40 * n * c,
        transcendentals=3 * n * c,
        bytes_accessed=n * c * itemsize + 4 * n + num_blocks * 8 * kc * 4,
    )

    out = pl.pallas_call(
        _make_kernel(n_rows, block_rows, k, need_row_mask),
        out_shape=jax.ShapeDtypeStruct((num_blocks * 8, kc), jnp.float32),
        grid=(num_blocks,),
        in_specs=[
            pl.BlockSpec((block_rows, kc), lambda i: (i, 0)),
            pl.BlockSpec((block_rows, k), lambda i: (i, 0)),
        ],
        out_specs=pl.BlockSpec((8, kc), lambda i: (i, 0)),
        compiler_params=pltpu.CompilerParams(
            dimension_semantics=("parallel",),
            vmem_limit_bytes=32 * 1024 * 1024),
        cost_estimate=cost,
    )(x2d, enc)

    # Per-block partials live in row 0 of each (8, kc) tile (rest are zeros); dense
    # reduction + the single /(N*C) normalization (== loss.mean(1).mean()).
    return jnp.sum(out) / jnp.float32(n * c)


def _reference(logits, targets):
    """Pure-JAX reference (mirrors the PyTorch module, in f32)."""
    c = logits.shape[-1]
    onehot = jax.nn.one_hot(targets, c, dtype=jnp.int32)
    x = logits.astype(jnp.float32)
    loss = jnp.where(onehot == 1,
                     -jax.scipy.special.log_ndtr(x),
                     -jax.scipy.special.log_ndtr(-x))
    return jnp.mean(jnp.mean(loss, axis=1))


if __name__ == "__main__":
    key = jax.random.PRNGKey(0)
    # (8, 32): tiny, lane-packed (k=4), single block.
    # (1000, 32): lane-packed, two blocks with a ragged (masked) tail, megacore path.
    # (13, 200): C > 128 (no packing), non-multiple-of-8 rows, single full block.
    for (n, c_) in [(8, 32), (1000, 32), (13, 200)]:
        key, k_logits, k_tgt = jax.random.split(key, 3)
        logits = jax.random.normal(k_logits, (n, c_), dtype=jnp.float32) * 2.0
        targets = jax.random.randint(k_tgt, (n,), 0, c_, dtype=jnp.int32)

        out = jax.block_until_ready(normcdf_nll_loss(logits, targets))
        ref = _reference(logits, targets)
        assert jnp.isfinite(out), (n, c_, "non-finite loss")
        assert abs(float(out) - float(ref)) < 2e-3, (n, c_, float(out), float(ref))

    print("KERNEL_OK")
</pallas_src>

<mosaic_0001>
module attributes {stable_mosaic.version = 11 : i64} {
  func.func @kernel(%arg0: i32, %arg1: memref<2x128xf32, #tpu.memory_space<vmem>>, %arg2: memref<2x4xi32, #tpu.memory_space<vmem>>, %arg3: memref<8x128xf32, #tpu.memory_space<vmem>>) attributes {dimension_semantics = [#tpu.dimension_semantics<parallel>], iteration_bounds = array<i64: 1>, scalar_prefetch = 0 : i64, scratch_operands = 0 : i64, tpu.core_type = #tpu.core_type<tc>, window_params = [{transform_indices = @transform_0, window_bounds = array<i64: 2, 128>}, {transform_indices = @transform_1, window_bounds = array<i64: 2, 4>}, {transform_indices = @transform_2, window_bounds = array<i64: 8, 128>}]} {
    %c0 = arith.constant 0 : index
    %c0_0 = arith.constant 0 : index
    %0 = vector.load %arg1[%c0, %c0_0] : memref<2x128xf32, #tpu.memory_space<vmem>>, vector<2x128xf32>
    %1 = tpu.iota {dimensions = array<i32: 1>} : vector<2x128xi32>
    %c0_1 = arith.constant 0 : index
    %c0_2 = arith.constant 0 : index
    %2 = vector.load %arg2[%c0_1, %c0_2] : memref<2x4xi32, #tpu.memory_space<vmem>>, vector<2x4xi32>
    %3 = vector.extract_strided_slice %2 {offsets = [0, 0], sizes = [2, 1], strides = [1, 1]} : vector<2x4xi32> to vector<2x1xi32>
    %4 = vector.broadcast %3 : vector<2x1xi32> to vector<2x128xi32>
    %5 = arith.cmpi eq, %1, %4 : vector<2x128xi32>
    %6 = vector.extract_strided_slice %2 {offsets = [0, 1], sizes = [2, 1], strides = [1, 1]} : vector<2x4xi32> to vector<2x1xi32>
    %7 = vector.broadcast %6 : vector<2x1xi32> to vector<2x128xi32>
    %8 = arith.cmpi eq, %1, %7 : vector<2x128xi32>
    %9 = arith.ori %5, %8 : vector<2x128xi1>
    %10 = vector.extract_strided_slice %2 {offsets = [0, 2], sizes = [2, 1], strides = [1, 1]} : vector<2x4xi32> to vector<2x1xi32>
    %11 = vector.broadcast %10 : vector<2x1xi32> to vector<2x128xi32>
    %12 = arith.cmpi eq, %1, %11 : vector<2x128xi32>
    %13 = arith.ori %9, %12 : vector<2x128xi1>
    %14 = vector.extract_strided_slice %2 {offsets = [0, 3], sizes = [2, 1], strides = [1, 1]} : vector<2x4xi32> to vector<2x1xi32>
    %15 = vector.broadcast %14 : vector<2x1xi32> to vector<2x128xi32>
    %16 = arith.cmpi eq, %1, %15 : vector<2x128xi32>
    %17 = arith.ori %13, %16 : vector<2x128xi1>
    %cst = arith.constant 0.000000e+00 : f32
    %18 = vector.broadcast %cst : f32 to vector<2x128xf32>
    %19 = arith.subf %18, %0 : vector<2x128xf32>
    %20 = arith.select %17, %0, %19 : vector<2x128xi1>, vector<2x128xf32>
    %21 = math.absf %20 : vector<2x128xf32>
    %cst_3 = arith.constant 0.707106769 : f32
    %22 = vector.broadcast %cst_3 : f32 to vector<2x128xf32>
    %23 = arith.mulf %21, %22 : vector<2x128xf32>
    %cst_4 = arith.constant 5.000000e-01 : f32
    %24 = vector.broadcast %cst_4 : f32 to vector<2x128xf32>
    %25 = arith.mulf %24, %23 : vector<2x128xf32>
    %cst_5 = arith.constant 1.000000e+00 : f32
    %26 = vector.broadcast %cst_5 : f32 to vector<2x128xf32>
    %27 = arith.addf %26, %25 : vector<2x128xf32>
    %28 = tpu.reciprocal %27 {approx = true} : vector<2x128xf32> -> vector<2x128xf32>
    %29 = arith.mulf %27, %28 : vector<2x128xf32>
    %cst_6 = arith.constant 2.000000e+00 : f32
    %30 = vector.broadcast %cst_6 : f32 to vector<2x128xf32>
    %31 = arith.subf %30, %29 : vector<2x128xf32>
    %32 = arith.mulf %28, %31 : vector<2x128xf32>
    %cst_7 = arith.constant 0.170872763 : f32
    %33 = vector.broadcast %cst_7 : f32 to vector<2x128xf32>
    %34 = arith.mulf %32, %33 : vector<2x128xf32>
    %cst_8 = arith.constant -0.822152256 : f32
    %35 = vector.broadcast %cst_8 : f32 to vector<2x128xf32>
    %36 = arith.addf %35, %34 : vector<2x128xf32>
    %37 = arith.mulf %32, %36 : vector<2x128xf32>
    %cst_9 = arith.constant 1.48851585 : f32
    %38 = vector.broadcast %cst_9 : f32 to vector<2x128xf32>
    %39 = arith.addf %38, %37 : vector<2x128xf32>
    %40 = arith.mulf %32, %39 : vector<2x128xf32>
    %cst_10 = arith.constant -1.13520396 : f32
    %41 = vector.broadcast %cst_10 : f32 to vector<2x128xf32>
    %42 = arith.addf %41, %40 : vector<2x128xf32>
    %43 = arith.mulf %32, %42 : vector<2x128xf32>
    %cst_11 = arith.constant 0.278868079 : f32
    %44 = vector.broadcast %cst_11 : f32 to vector<2x128xf32>
    %45 = arith.addf %44, %43 : vector<2x128xf32>
    %46 = arith.mulf %32, %45 : vector<2x128xf32>
    %cst_12 = arith.constant -0.186288059 : f32
    %47 = vector.broadcast %cst_12 : f32 to vector<2x128xf32>
    %48 = arith.addf %47, %46 : vector<2x128xf32>
    %49 = arith.mulf %32, %48 : vector<2x128xf32>
    %cst_13 = arith.constant 0.0967841818 : f32
    %50 = vector.broadcast %cst_13 : f32 to vector<2x128xf32>
    %51 = arith.addf %50, %49 : vector<2x128xf32>
    %52 = arith.mulf %32, %51 : vector<2x128xf32>
    %cst_14 = arith.constant 0.374091953 : f32
    %53 = vector.broadcast %cst_14 : f32 to vector<2x128xf32>
    %54 = arith.addf %53, %52 : vector<2x128xf32>
    %55 = arith.mulf %32, %54 : vector<2x128xf32>
    %cst_15 = arith.constant 1.00002372 : f32
    %56 = vector.broadcast %cst_15 : f32 to vector<2x128xf32>
    %57 = arith.addf %56, %55 : vector<2x128xf32>
    %58 = arith.mulf %32, %57 : vector<2x128xf32>
    %cst_16 = arith.constant -1.26551223 : f32
    %59 = vector.broadcast %cst_16 : f32 to vector<2x128xf32>
    %60 = arith.addf %59, %58 : vector<2x128xf32>
    %61 = arith.mulf %23, %23 : vector<2x128xf32>
    %62 = arith.subf %60, %61 : vector<2x128xf32>
    %cst_17 = arith.constant 5.000000e-01 : f32
    %63 = vector.broadcast %cst_17 : f32 to vector<2x128xf32>
    %64 = arith.mulf %63, %32 : vector<2x128xf32>
    %65 = math.exp %62 : vector<2x128xf32>
    %66 = arith.mulf %64, %65 : vector<2x128xf32>
    %cst_18 = arith.constant 0.000000e+00 : f32
    %67 = vector.broadcast %cst_18 : f32 to vector<2x128xf32>
    %68 = arith.cmpf olt, %20, %67 : vector<2x128xf32>
    %cst_19 = arith.constant 5.000000e-01 : f32
    %69 = vector.broadcast %cst_19 : f32 to vector<2x128xf32>
    %70 = arith.mulf %69, %32 : vector<2x128xf32>
    %cst_20 = arith.constant 1.000000e+00 : f32
    %71 = vector.broadcast %cst_20 : f32 to vector<2x128xf32>
    %72 = arith.subf %71, %66 : vector<2x128xf32>
    %73 = arith.select %68, %70, %72 : vector<2x128xi1>, vector<2x128xf32>
    %74 = math.log %73 : vector<2x128xf32>
    %75 = arith.addf %62, %74 : vector<2x128xf32>
    %cst_21 = arith.constant 9.99999974E-5 : f32
    %76 = vector.broadcast %cst_21 : f32 to vector<2x128xf32>
    %77 = arith.cmpf olt, %66, %76 : vector<2x128xf32>
    %cst_22 = arith.constant 0.000000e+00 : f32
    %78 = vector.broadcast %cst_22 : f32 to vector<2x128xf32>
    %79 = arith.subf %78, %66 : vector<2x128xf32>
    %cst_23 = arith.constant 5.000000e-01 : f32
    %80 = vector.broadcast %cst_23 : f32 to vector<2x128xf32>
    %81 = arith.mulf %80, %66 : vector<2x128xf32>
    %cst_24 = arith.constant 1.000000e+00 : f32
    %82 = vector.broadcast %cst_24 : f32 to vector<2x128xf32>
    %83 = arith.addf %82, %81 : vector<2x128xf32>
    %84 = arith.mulf %79, %83 : vector<2x128xf32>
    %85 = arith.select %77, %84, %74 : vector<2x128xi1>, vector<2x128xf32>
    %86 = arith.select %68, %75, %85 : vector<2x128xi1>, vector<2x128xf32>
    %cst_25 = arith.constant 0.000000e+00 : f32
    %87 = vector.broadcast %cst_25 : f32 to vector<2x128xf32>
    %88 = arith.subf %87, %86 : vector<2x128xf32>
    %cst_26 = arith.constant dense<0.000000e+00> : vector<128xf32>
    %89 = vector.multi_reduction <add>, %88, %cst_26 [0] : vector<2x128xf32> to vector<128xf32>
    %90 = vector.shape_cast %89 : vector<128xf32> to vector<1x128xf32>
    %91 = tpu.iota {dimensions = array<i32: 0>} : vector<8x128xi32>
    %c0_i32 = arith.constant 0 : i32
    %92 = vector.broadcast %c0_i32 : i32 to vector<8x128xi32>
    %93 = arith.cmpi eq, %91, %92 : vector<8x128xi32>
    %94 = vector.shape_cast %90 : vector<1x128xf32> to vector<1x128xf32>
    %95 = vector.broadcast %94 : vector<1x128xf32> to vector<8x128xf32>
    %cst_27 = arith.constant 0.000000e+00 : f32
    %96 = vector.broadcast %cst_27 : f32 to vector<8x128xf32>
    %97 = arith.select %93, %95, %96 : vector<8x128xi1>, vector<8x128xf32>
    %c0_28 = arith.constant 0 : index
    %c0_29 = arith.constant 0 : index
    %98 = vector.load %arg3[%c0_28, %c0_29] : memref<8x128xf32, #tpu.memory_space<vmem>>, vector<8x128xf32>
    tpu.vector_store %arg3[%c0_28, %c0_29], %97 {strides = array<i32>} : memref<8x128xf32, #tpu.memory_space<vmem>>, vector<8x128xf32>,
    return
  }
  func.func @transform_0(%arg0: i32) -> (i32, i32) {
    %c0_i32 = arith.constant 0 : i32
    %c0_i32_0 = arith.constant 0 : i32
    return %arg0, %c0_i32 : i32, i32
  }
  func.func @transform_1(%arg0: i32) -> (i32, i32) {
    %c0_i32 = arith.constant 0 : i32
    %c0_i32_0 = arith.constant 0 : i32
    return %arg0, %c0_i32 : i32, i32
  }
  func.func @transform_2(%arg0: i32) -> (i32, i32) {
    %c0_i32 = arith.constant 0 : i32
    %c0_i32_0 = arith.constant 0 : i32
    return %arg0, %c0_i32 : i32, i32
  }
}

</mosaic_0001>

<bundles_post_ra>
// kernel: tpu_custom_call.1
= control target key start
LH: loop header
LB: loop body
LE: loop exit
PB: predicated region body
PF: predicated region fallthrough
CT: control target
= control target key end

     0   :  { %7 = vsyncpa [#allocation3], 0  ;;  %s271_s0 = inlined_call_operand.hbm [shape: f32[2,128], index: 0, kind: input, shape index: {}]   ;;  %s272_s1 = inlined_call_operand.hbm [shape: s32[2,4], index: 1, kind: input, shape index: {}]   ;;  %s273_s2 = inlined_call_operand.hbm [shape: f32[8,128], index: 2, kind: output, shape index: {}]  }
   0x1   :  { %8 = vsyncpa [#allocation6], 0 }
   0x2   :  { %9 = vsyncpa [#allocation4], 0  ;;  %s15_s11 = sshll.u32 %s271_s0, 4  ;;  %s238_s12 = smov [#allocation2]   ;;  %s16_s11 = int_to_ptr.hbm [resolvable:$true] %s15_s11 }
   0x3   :  { %s17_s13 = sshll.u32 %s238_s12, 4  ;;  %s26_s16 = sshll.u32 %s272_s1, 4  ;;  %s18_s13 = int_to_ptr.vmem [resolvable:$true] %s17_s13  ;;  %s27_s16 = int_to_ptr.hbm [resolvable:$true] %s26_s16 }
   0x4   :  { %20 = dma.hbm_to_vmem [thread:$0]  %s16_s11, 32, %s18_s13, [#allocation3]  }
   0x5   :  { %s239_s17 = smov [#allocation5]  }
   0x6   :  { %s28_s18 = sshll.u32 %s239_s17, 4  ;;  %s29_s18 = int_to_ptr.vmem [resolvable:$true] %s28_s18 }
   0x7   :  { %31 = dma.hbm_to_vmem [thread:$0]  %s27_s16, 32, %s29_s18, [#allocation6]  }
   0x8   :  { %232 = dma.done.wait [#allocation3], 32  }
   0x9   :  { %233 = vsyncadd [#allocation3], 4294967264 }
   0xa   :  { %234 = dma.done.wait [#allocation6], 32  }
   0xb   :  { %235 = vsyncadd [#allocation6], 4294967264  ;;  %v240_v0 = vmov 0   ;;  %v241_v1 = vmov 2   ;;  %v43_v2 = vld [vmem:[#allocation5] sm:$0x3]  ;;  %v41_v7 = vlaneseq }
   0xc   :  { %149 = vset.pattern.permute.xlu0 %v240_v0  ;;  %151 = vset.pattern.permute.xlu1 %v241_v1  ;;  %v242_v3 = vmov 1   ;;  %v243_v4 = vmov 3   ;;  %v40_v9 = vld [vmem:[#allocation2] sm:$0x3]  ;;  %vm111_vm9 = vcmask 1041408   ;;  %s244_s0 = smov [#allocation7]  }
   0xd   :  { %45 = vperm.xlu0 %149, %v43_v2   ;;  %54 = vperm.xlu1 %151, %v43_v2   ;;  %v42_v8 = vand.u32 127, %v41_v7  ;;  %v63_v12 = vsub.f32 0.0, %v40_v9  ;;  %v120_v62 = vshrl.u32 %v41_v7, 7  ;;  %s129_s1 = sshll.u32 %s244_s0, 4  ;;  %s131_s21 = sshll.u32 %s273_s2, 4  ;;  %s130_s1 = int_to_ptr.vmem [resolvable:$true] %s129_s1  ;;  %s132_s21 = int_to_ptr.hbm [resolvable:$true] %s131_s21 }
   0xf   :  { %vm121_vm10 = vcmp.eq.s32.totalorder %v120_v62, 0 }
  0x15   :  { %150 = vset.pattern.permute.xlu0 %v242_v3  ;;  %152 = vset.pattern.permute.xlu1 %v243_v4 }
  0x16   :  { %49 = vperm.xlu0 %150, %v43_v2   ;;  %59 = vperm.xlu1 %152, %v43_v2  }
  0x1e   :  { %153 = vset.pattern.permute.xlu0 %v243_v4 }
  0x7f   :  { %v46_v5 = vpop.permute.xlu0 %45  ;;  %v55_v6 = vpop.permute.xlu1 %54 }
  0x80   :  { %vm47_vm0 = vcmp.eq.s32.totalorder %v42_v8, %v46_v5  ;;  %vm56_vm3 = vcmp.eq.s32.totalorder %v42_v8, %v55_v6 }
  0x88   :  { %v50_v10 = vpop.permute.xlu0 %49  ;;  %v60_v11 = vpop.permute.xlu1 %59 }
  0x89   :  { %vm51_vm1 = vcmp.eq.s32.totalorder %v42_v8, %v50_v10  ;;  %vm61_vm2 = vcmp.eq.s32.totalorder %v42_v8, %v60_v11 }
  0x8a   :  { %vm52_vm4 = vmor %vm47_vm0, %vm51_vm1 }
  0x8b   :  { %vm57_vm5 = vmor %vm52_vm4, %vm56_vm3 }
  0x8c   :  { %vm62_vm6 = vmor %vm57_vm5, %vm61_vm2 }
  0x8d   :  { %v64_v13 = vsel %vm62_vm6, %v40_v9, %v63_v12 }
  0x8e   :  { %v65_v14 = vand.u32 2147483647, %v64_v13  ;;  %vm97_vm7 = vcmp.lt.f32.partialorder %v64_v13, 0.0 }
  0x90   :  { %v66_v15 = vmul.f32 0.70710677, %v65_v14 }
  0x92   :  { %v67_v16 = vmul.f32 0.5, %v66_v15  ;;  %v91_v40 = vmul.f32 %v66_v15, %v66_v15 }
  0x94   :  { %v68_v17 = vadd.f32 1.0, %v67_v16 }
  0x96   :  { %154 = vrcp.f32 %v68_v17 }
  0x9c   :  { %v155_v18 = vpop.eup %154 }
  0x9d   :  { %v70_v19 = vmul.f32 %v155_v18, %v68_v17 }
  0x9f   :  { %v71_v20 = vsub.f32 2.0, %v70_v19 }
  0xa1   :  { %v72_v21 = vmul.f32 %v155_v18, %v71_v20 }
  0xa3   :  { %v73_v22 = vmul.f32 0.17087276, %v72_v21  ;;  %v93_v43 = vmul.f32 0.5, %v72_v21 }
  0xa5   :  { %v74_v23 = vadd.f32 -0.82215226, %v73_v22 }
  0xa7   :  { %v75_v24 = vmul.f32 %v74_v23, %v72_v21 }
  0xa9   :  { %v76_v25 = vadd.f32 1.4885159, %v75_v24 }
  0xab   :  { %v77_v26 = vmul.f32 %v76_v25, %v72_v21 }
  0xad   :  { %v78_v27 = vadd.f32 -1.135204, %v77_v26 }
  0xaf   :  { %v79_v28 = vmul.f32 %v78_v27, %v72_v21 }
  0xb1   :  { %v80_v29 = vadd.f32 0.27886808, %v79_v28 }
  0xb3   :  { %v81_v30 = vmul.f32 %v80_v29, %v72_v21 }
  0xb5   :  { %v82_v31 = vadd.f32 -0.18628806, %v81_v30 }
  0xb7   :  { %v83_v32 = vmul.f32 %v82_v31, %v72_v21 }
  0xb9   :  { %v84_v33 = vadd.f32 0.09678418, %v83_v32 }
  0xbb   :  { %v85_v34 = vmul.f32 %v84_v33, %v72_v21 }
  0xbd   :  { %v86_v35 = vadd.f32 0.37409195, %v85_v34 }
  0xbf   :  { %v87_v36 = vmul.f32 %v86_v35, %v72_v21 }
  0xc1   :  { %v88_v37 = vadd.f32 1.0000237, %v87_v36 }
  0xc3   :  { %v89_v38 = vmul.f32 %v88_v37, %v72_v21 }
  0xc5   :  { %v90_v39 = vadd.f32 -1.2655122, %v89_v38 }
  0xc7   :  { %v92_v41 = vsub.f32 %v90_v39, %v91_v40 }
  0xc9   :  { %v94_v42 = vmul.f32 1.442695, %v92_v41 }
  0xcb   :  { %156 = vpow2.f32 %v94_v42 }
  0xd1   :  { %v157_v44 = vpop.eup %156 }
  0xd2   :  { %v96_v45 = vmul.f32 %v157_v44, %v93_v43 }
  0xd4   :  { %v98_v46 = vsub.f32 1.0, %v96_v45  ;;  %v105_v48 = vmul.f32 0.5, %v96_v45  ;;  %v104_v50 = vsub.f32 0.0, %v96_v45  ;;  %vm103_vm8 = vcmp.lt.f32.partialorder %v96_v45, 0.0001 }
  0xd6   :  { %v99_v47 = vsel %vm97_vm7, %v93_v43, %v98_v46  ;;  %v106_v49 = vadd.f32 1.0, %v105_v48 }
  0xd7   :  { %158 = vlog2.f32 %v99_v47 }
  0xd8   :  { %v107_v53 = vmul.f32 %v106_v49, %v104_v50 }
  0xdd   :  { %v159_v51 = vpop.eup %158 }
  0xde   :  { %v101_v52 = vmul.f32 0.6931472, %v159_v51 }
  0xe0   :  { %v102_v54 = vadd.f32 %v101_v52, %v92_v41  ;;  %v108_v55 = vsel %vm103_vm8, %v107_v53, %v101_v52 }
  0xe2   :  { %v109_v56 = vsel %vm97_vm7, %v102_v54, %v108_v55 }
  0xe3   :  { %v110_v57 = vsub.f32 0.0, %v109_v56 }
  0xe5   :  { %v112_v58 = vsel %vm111_vm9, %v110_v57, 0.0 }
  0xe6   :  { %v113_v59 = vrot.slane %v112_v58, 4 }
  0xe8   :  { %v114_v60 = vadd.f32 %v113_v59, %v112_v58 }
  0xea   :  { %v115_v61 = vrot.slane %v114_v60, 2 }
  0xec   :  { %v116_v63 = vadd.f32 %v115_v61, %v114_v60 }
  0xee   :  { %v117_v0 = vrot.slane %v116_v63, 1 }
  0xf0   :  { %v118_v1 = vadd.f32 %v117_v0, %v116_v63 }
  0xf2   :  { %v122_v2 = vsel %vm121_vm10, %v118_v1, 0.0 }
  0xf3   :  { %123 = vst [vmem:[#allocation7] sm:$0xff] %v122_v2 }
  0xf4   :  { %134 = dma.vmem_to_hbm [thread:$0]  %s130_s1, 128, %s132_s21, [#allocation4]  }
  0xf5   :  { %236 = dma.done.wait [#allocation4], 128  }
  0xf6   :  { %237 = vsyncadd [#allocation4], 4294967168 }
  0xf7   :  { %139 = vsyncpa [#allocation3], 1 }
  0xf8   :  { %140 = vsyncpa [#allocation6], 1 }
  0xf9   :  { %141 = vsyncpa [#allocation4], 1 }

</bundles_post_ra>
